<compile_context>
chip_gen: v5e
topology: v5e:2x2
jax: 0.10.0
libtpu: 0.0.40
codegen_flags: <defaults>
</compile_context>

<pallas_src>
import jax
import jax.numpy as jnp
from jax.experimental import pallas as pl
from jax.experimental.pallas import tpu as pltpu


def _make_kernel(B, C, S, H):
    def kernel(x_ref, p_ref, out_ref):
        # x_ref  : SMEM f32[B*C*S] -- x in its original (B, C, S) layout, flattened.
        # p_ref  : VMEM f32[C+3, H] -- rows: [w1^T (C rows), b1, w2, b2*ones].
        # out_ref: SMEM f32[1]      -- scalar result.
        b1v = p_ref[C:C + 1, :]        # (1, H)
        w2v = p_ref[C + 1:C + 2, :]    # (1, H)
        b2v = p_ref[C + 2:C + 3, :]    # (1, H)

        t_acc = jnp.zeros((1, H), jnp.float32)
        # Static unroll over the B*S rows of x.permute(0, 2, 1).reshape(B*S, C).
        for b in range(B):
            for s in range(S):
                # First linear layer for this row, on the VPU:
                #   h[n] = sum_c x[b, c, s] * w1[n, c] + b1[n]
                h = b1v
                for c in range(C):
                    x_bcs = x_ref[(b * C + c) * S + s]       # scalar read from SMEM
                    h = h + x_bcs * p_ref[c:c + 1, :]        # (1, H) FMA on VPU
                m = jnp.max(h, axis=-1, keepdims=True)       # (1, 1)
                # torch.max over a size-1 dim is identity => x + max(x) == 2*x (exact).
                u = 2.0 * m
                e = (u == -1.0).astype(jnp.float32)          # (1, 1)
                # Second "linear": outer product with w2 (see TODO above) + bias.
                y = e * w2v + b2v                            # (1, H)
                # hardtanh(tanh(y), -1, 1) == tanh(y) exactly.
                t_acc = t_acc + jnp.tanh(y)
        out_ref[0] = jnp.sum(t_acc)

    return kernel


@jax.jit
def model_forward(x, w1, b1, w2, b2):
    """x: (B, C, S) f32; w1: (H, C); b1: (H,); w2: (H,); b2: (1,). Returns scalar f32."""
    B, C, S = x.shape
    H = w1.shape[0]

    # Single packed parameter slab -> one VMEM operand / one DMA.
    params = jnp.concatenate(
        [
            w1.T.astype(jnp.float32),                               # (C, H)
            b1.reshape(1, H).astype(jnp.float32),                   # (1, H)
            w2.reshape(1, H).astype(jnp.float32),                   # (1, H)
            jnp.broadcast_to(b2.reshape(1, 1), (1, H)).astype(jnp.float32),  # (1, H)
        ],
        axis=0,
    )                                                                # (C+3, H)
    x_flat = x.reshape(-1).astype(jnp.float32)                       # (B*C*S,) -> SMEM

    out = pl.pallas_call(
        _make_kernel(B, C, S, H),
        out_shape=jax.ShapeDtypeStruct((1,), jnp.float32),
        in_specs=[
            pl.BlockSpec(memory_space=pltpu.MemorySpace.SMEM),
            pl.BlockSpec(memory_space=pltpu.MemorySpace.VMEM),
        ],
        out_specs=pl.BlockSpec(memory_space=pltpu.MemorySpace.SMEM),
    )(x_flat, params)
    return out[0]


if __name__ == "__main__":
    key = jax.random.PRNGKey(0)
    k_x, k_w, k_b = jax.random.split(key, 3)

    B, C, S, H = 1, 2, 2, 32

    # Example input (matches torch.randn(1, 2, 2)).
    x = jax.random.normal(k_x, (B, C, S), dtype=jnp.float32)

    # Linear(2, 32) parameters (PyTorch-style uniform init bound), deterministic.
    bound = 1.0 / (C ** 0.5)
    w1 = jax.random.uniform(k_w, (H, C), jnp.float32, -bound, bound)
    b1 = jax.random.uniform(k_b, (H,), jnp.float32, -bound, bound)

    # self.weight = zeros(32), self.bias = zeros(1) (as in the module __init__).
    w2 = jnp.zeros((H,), dtype=jnp.float32)
    b2 = jnp.zeros((1,), dtype=jnp.float32)

    result = model_forward(x, w1, b1, w2, b2)
    jax.block_until_ready(result)
    print("KERNEL_OK")
</pallas_src>

<mosaic_0001>
module attributes {stable_mosaic.version = 11 : i64} {
  func.func @kernel(%arg0: memref<4xf32, #tpu.memory_space<smem>>, %arg1: memref<5x32xf32, #tpu.memory_space<vmem>>, %arg2: memref<1xf32, #tpu.memory_space<smem>>) attributes {dimension_semantics = [], scalar_prefetch = 0 : i64, scratch_operands = 0 : i64, tpu.core_type = #tpu.core_type<tc>} {
    %c2 = arith.constant 2 : index
    %c0 = arith.constant 0 : index
    %0 = vector.load %arg1[%c2, %c0] : memref<5x32xf32, #tpu.memory_space<vmem>>, vector<1x32xf32>
    %c3 = arith.constant 3 : index
    %c0_0 = arith.constant 0 : index
    %1 = vector.load %arg1[%c3, %c0_0] : memref<5x32xf32, #tpu.memory_space<vmem>>, vector<1x32xf32>
    %c4 = arith.constant 4 : index
    %c0_1 = arith.constant 0 : index
    %2 = vector.load %arg1[%c4, %c0_1] : memref<5x32xf32, #tpu.memory_space<vmem>>, vector<1x32xf32>
    %cst = arith.constant 0.000000e+00 : f32
    %3 = vector.broadcast %cst : f32 to vector<1x32xf32>
    %c0_2 = arith.constant 0 : index
    %4 = memref.load %arg0[%c0_2] : memref<4xf32, #tpu.memory_space<smem>>
    %c0_3 = arith.constant 0 : index
    %c0_4 = arith.constant 0 : index
    %5 = vector.load %arg1[%c0_3, %c0_4] : memref<5x32xf32, #tpu.memory_space<vmem>>, vector<1x32xf32>
    %6 = vector.broadcast %4 : f32 to vector<1x32xf32>
    %7 = arith.mulf %6, %5 : vector<1x32xf32>
    %8 = arith.addf %0, %7 : vector<1x32xf32>
    %c2_5 = arith.constant 2 : index
    %9 = memref.load %arg0[%c2_5] : memref<4xf32, #tpu.memory_space<smem>>
    %c1 = arith.constant 1 : index
    %c0_6 = arith.constant 0 : index
    %10 = vector.load %arg1[%c1, %c0_6] : memref<5x32xf32, #tpu.memory_space<vmem>>, vector<1x32xf32>
    %11 = vector.broadcast %9 : f32 to vector<1x32xf32>
    %12 = arith.mulf %11, %10 : vector<1x32xf32>
    %13 = arith.addf %8, %12 : vector<1x32xf32>
    %cst_7 = arith.constant dense<0xFF800000> : vector<1xf32>
    %14 = vector.multi_reduction <maximumf>, %13, %cst_7 [1] : vector<1x32xf32> to vector<1xf32>
    %15 = vector.shape_cast %14 : vector<1xf32> to vector<1x1xf32>
    %cst_8 = arith.constant 2.000000e+00 : f32
    %16 = vector.broadcast %cst_8 : f32 to vector<1x1xf32>
    %17 = arith.mulf %16, %15 : vector<1x1xf32>
    %cst_9 = arith.constant -1.000000e+00 : f32
    %18 = vector.broadcast %cst_9 : f32 to vector<1x1xf32>
    %19 = arith.cmpf oeq, %17, %18 : vector<1x1xf32>
    %20 = arith.extui %19 : vector<1x1xi1> to vector<1x1xi32>
    %21 = arith.sitofp %20 : vector<1x1xi32> to vector<1x1xf32>
    %22 = vector.broadcast %21 : vector<1x1xf32> to vector<1x32xf32>
    %23 = arith.mulf %22, %1 : vector<1x32xf32>
    %24 = arith.addf %23, %2 : vector<1x32xf32>
    %25 = math.tanh %24 : vector<1x32xf32>
    %26 = arith.addf %3, %25 : vector<1x32xf32>
    %c1_10 = arith.constant 1 : index
    %27 = memref.load %arg0[%c1_10] : memref<4xf32, #tpu.memory_space<smem>>
    %c0_11 = arith.constant 0 : index
    %c0_12 = arith.constant 0 : index
    %28 = vector.load %arg1[%c0_11, %c0_12] : memref<5x32xf32, #tpu.memory_space<vmem>>, vector<1x32xf32>
    %29 = vector.broadcast %27 : f32 to vector<1x32xf32>
    %30 = arith.mulf %29, %28 : vector<1x32xf32>
    %31 = arith.addf %0, %30 : vector<1x32xf32>
    %c3_13 = arith.constant 3 : index
    %32 = memref.load %arg0[%c3_13] : memref<4xf32, #tpu.memory_space<smem>>
    %c1_14 = arith.constant 1 : index
    %c0_15 = arith.constant 0 : index
    %33 = vector.load %arg1[%c1_14, %c0_15] : memref<5x32xf32, #tpu.memory_space<vmem>>, vector<1x32xf32>
    %34 = vector.broadcast %32 : f32 to vector<1x32xf32>
    %35 = arith.mulf %34, %33 : vector<1x32xf32>
    %36 = arith.addf %31, %35 : vector<1x32xf32>
    %cst_16 = arith.constant dense<0xFF800000> : vector<1xf32>
    %37 = vector.multi_reduction <maximumf>, %36, %cst_16 [1] : vector<1x32xf32> to vector<1xf32>
    %38 = vector.shape_cast %37 : vector<1xf32> to vector<1x1xf32>
    %cst_17 = arith.constant 2.000000e+00 : f32
    %39 = vector.broadcast %cst_17 : f32 to vector<1x1xf32>
    %40 = arith.mulf %39, %38 : vector<1x1xf32>
    %cst_18 = arith.constant -1.000000e+00 : f32
    %41 = vector.broadcast %cst_18 : f32 to vector<1x1xf32>
    %42 = arith.cmpf oeq, %40, %41 : vector<1x1xf32>
    %43 = arith.extui %42 : vector<1x1xi1> to vector<1x1xi32>
    %44 = arith.sitofp %43 : vector<1x1xi32> to vector<1x1xf32>
    %45 = vector.broadcast %44 : vector<1x1xf32> to vector<1x32xf32>
    %46 = arith.mulf %45, %1 : vector<1x32xf32>
    %47 = arith.addf %46, %2 : vector<1x32xf32>
    %48 = math.tanh %47 : vector<1x32xf32>
    %49 = arith.addf %26, %48 : vector<1x32xf32>
    %50 = vector.shape_cast %49 : vector<1x32xf32> to vector<1x1x32xf32>
    %cst_19 = arith.constant dense<0.000000e+00> : vector<1xf32>
    %51 = vector.multi_reduction <add>, %50, %cst_19 [1, 2] : vector<1x1x32xf32> to vector<1xf32>
    %52 = vector.shape_cast %51 : vector<1xf32> to vector<1x1x1xf32>
    %53 = vector.extract %52[0, 0, 0] : f32 from vector<1x1x1xf32>
    %c0_20 = arith.constant 0 : index
    %54 = memref.load %arg2[%c0_20] : memref<1xf32, #tpu.memory_space<smem>>
    memref.store %53, %arg2[%c0_20] : memref<1xf32, #tpu.memory_space<smem>>
    return
  }
}

</mosaic_0001>

<bundles_post_ra>
// kernel: model_forward.1
= control target key start
LH: loop header
LB: loop body
LE: loop exit
PB: predicated region body
PF: predicated region fallthrough
CT: control target
= control target key end

     0   :  { %7 = vsyncpa [#allocation4], 0  ;;  %s181_s0 = inlined_call_operand.vmem [shape: f32[4], index: 0, kind: input, shape index: {}]   ;;  %s182_s1 = inlined_call_operand.vmem [shape: f32[5,32], index: 1, kind: input, shape index: {}]   ;;  %s183_s2 = inlined_call_operand.hbm [shape: f32[1], index: 2, kind: output, shape index: {}]  }
   0x1   :  { %8 = vsyncpa [#allocation3], 0  ;;  %s14_s11 = sshll.u32 %s181_s0, 4  ;;  %s139_s12 = smov [#allocation2]   ;;  %s15_s11 = int_to_ptr.vmem [resolvable:$true] %s14_s11 }
   0x2   :  { %17 = dma.vmem_to_smem %s15_s11, 16, %s139_s12, [#allocation4]  }
   0x3   :  { %135 = dma.done.wait [#allocation4], 16  }
   0x4   :  { %136 = vsyncadd [#allocation4], 4294967280 }
   0x5   :  { %24 = sfence }
   0x6   :  { %s28_s13 = sld [smem:[#allocation2]]  ;;  %v29_v0 = vld [vmem:[%s182_s1] sm:$0x1]  ;;  %v34_v1 = vld [vmem:[%s182_s1 + $0x1] sm:$0x1]  ;;  %vm38_vm0 = vcmask 253952  }
   0x7   :  { %s97_s14 = sld [smem:[#allocation2 + $0x2]]  ;;  %v25_v2 = vld [vmem:[%s182_s1 + $0x2] sm:$0x1]  ;;  %v26_v19 = vld [vmem:[%s182_s1 + $0x3] sm:$0x1]  ;;  %v140_v20 = vmov 0.0  }
   0x8   :  { %s99_s15 = sld [smem:[#allocation2 + $0x1]]  ;;  %v27_v24 = vld [vmem:[%s182_s1 + $0x4] sm:$0x1]  ;;  %s86_s27 = sshll.u32 %s183_s2, 4  ;;  %s87_s27 = int_to_ptr.hbm [resolvable:$true] %s86_s27 }
   0x9   :  { %s100_s16 = sld [smem:[#allocation2 + $0x3]]  ;;  %s141_s29 = smov [#allocation5]  }
   0xc   :  { %v30_v3 = vstv %s28_s13 }
   0xd   :  { %v31_v4 = vmul.f32 %v30_v3, %v29_v0  ;;  %v35_v5 = vstv %s97_s14 }
   0xe   :  { %v36_v6 = vmul.f32 %v35_v5, %v34_v1  ;;  %v51_v7 = vstv %s99_s15 }
   0xf   :  { %v32_v8 = vadd.f32 %v31_v4, %v25_v2  ;;  %v52_v9 = vmul.f32 %v51_v7, %v29_v0  ;;  %v55_v10 = vstv %s100_s16 }
  0x10   :  { %v56_v13 = vmul.f32 %v55_v10, %v34_v1 }
  0x11   :  { %v37_v11 = vadd.f32 %v36_v6, %v32_v8  ;;  %v53_v12 = vadd.f32 %v52_v9, %v25_v2 }
  0x13   :  { %v39_v14 = vsel %vm38_vm0, %v37_v11, -inf  ;;  %v57_v15 = vadd.f32 %v56_v13, %v53_v12 }
  0x14   :  { %40 = vmax.xlane.f32.xlu0 %v39_v14 }
  0x15   :  { %v58_v16 = vsel %vm38_vm0, %v57_v15, -inf }
  0x1c   :  { %59 = vmax.xlane.f32.xlu0 %v58_v16 }
  0x87   :  { %v41_v17 = vpop.xlane.xlu0 %40 }
  0x88   :  { %v42_v18 = vmul.f32 2.0, %v41_v17 }
  0x8a   :  { %vm43_vm1 = vcmp.eq.f32.partialorder %v42_v18, -1.0 }
  0x8b   :  { %v98_v21 = vsel %vm43_vm1, 1.0, %v140_v20 }
  0x8c   :  { %v46_v22 = vmul.f32 %v98_v21, %v26_v19 }
  0x8e   :  { %v47_v26 = vadd.f32 %v46_v22, %v27_v24 }
  0x8f   :  { %v60_v23 = vpop.xlane.xlu0 %59 }
  0x90   :  { %v61_v25 = vmul.f32 2.0, %v60_v23  ;;  %107 = vtanh.f32 %v47_v26 }
  0x92   :  { %vm62_vm2 = vcmp.eq.f32.partialorder %v61_v25, -1.0 }
  0x93   :  { %v101_v27 = vsel %vm62_vm2, 1.0, %v140_v20 }
  0x94   :  { %v65_v28 = vmul.f32 %v101_v27, %v26_v19 }
  0x96   :  { %v66_v29 = vadd.f32 %v65_v28, %v27_v24  ;;  %v108_v30 = vpop.eup %107 }
  0x98   :  { %109 = vtanh.f32 %v66_v29 }
  0x9e   :  { %v110_v31 = vpop.eup %109 }
  0x9f   :  { %v68_v32 = vadd.f32 %v110_v31, %v108_v30 }
  0xa1   :  { %v69_v33 = vsel %vm38_vm0, %v68_v32, 0.0 }
  0xa2   :  { %70 = vadd.xlane.f32.xlu1 %v69_v33 }
 0x115   :  { %v71_v34 = vpop.xlane.xlu1 %70 }
 0x116   :  { %v72_v35 = vrot.slane %v71_v34, 4 }
 0x118   :  { %v73_v36 = vadd.f32 %v72_v35, %v71_v34 }
 0x11a   :  { %v74_v37 = vrot.slane %v73_v36, 2 }
 0x11c   :  { %v75_v38 = vadd.f32 %v74_v37, %v73_v36 }
 0x11e   :  { %v76_v39 = vrot.slane %v75_v38, 1 }
 0x120   :  { %v77_v40 = vadd.f32 %v76_v39, %v75_v38 }
 0x122   :  { %102 = vpush %v77_v40 }
 0x153   :  { %s103_s28 = spop %102 }
 0x154   :  { %80 = sst [smem:[#allocation5]] %s103_s28 }
 0x155   :  { %89 = dma.smem_to_hbm %s141_s29, 16, %s87_s27, [#allocation3]  }
 0x156   :  { %137 = dma.done.wait [#allocation3], 16  }
 0x157   :  { %138 = vsyncadd [#allocation3], 4294967280 }
 0x158   :  { %94 = sfence }
 0x159   :  { %95 = vsyncpa [#allocation3], 1 }
 0x15a   :  { %96 = vsyncpa [#allocation4], 1 }

</bundles_post_ra>
